<compile_context>
chip_gen: v5e
topology: v5e:2x2
jax: 0.10.0
libtpu: 0.0.40
codegen_flags: <defaults>
</compile_context>

<pallas_src>
import functools

import jax
import jax.numpy as jnp
from jax.experimental import pallas as pl
from jax.experimental.pallas import tpu as pltpu

EPS = 1e-5


def student_kernel(x_ref, w1_ref, w2_ref, g1_ref, be1_ref, g2_ref, be2_ref,
                   o_ref, *, types_per_block, compute_dtype):
    # x_ref:  [TPB, N, Fin]   w1_ref: [TPB, Fin, H]   w2_ref: [TPB, H, H]
    # g*/be*: [1, H] (shared)  o_ref:  [TPB, N, H]

    # Shared BN params: load once per grid step (hoisted out of the type loop).
    g1 = g1_ref[...]
    be1 = be1_ref[...]
    g2 = g2_ref[...]
    be2 = be2_ref[...]

    def mm(a, b):
        if compute_dtype != jnp.float32:
            a = a.astype(compute_dtype)
            b = b.astype(compute_dtype)
        return jnp.dot(a, b, preferred_element_type=jnp.float32)

    def bn(h, gamma, beta):
        # Folded BN: single FMA per element; var via E[h^2] - E[h]^2 so h is
        # swept once before the cross-sublane reduce.
        mean = jnp.mean(h, axis=0, keepdims=True)
        msq = jnp.mean(h * h, axis=0, keepdims=True)
        var = msq - mean * mean
        scale = gamma * jax.lax.rsqrt(var + EPS)
        shift = beta - scale * mean
        return h * scale + shift

    # Static (unrolled) loop over the node types handled by this grid step.
    for i in range(types_per_block):
        x = x_ref[i]                               # [N, Fin]
        # HetLinear #1 (bias omitted: cancelled exactly by BN mean subtraction)
        h = mm(x, w1_ref[i])                       # [N, H] f32
        h = bn(h, g1, be1)
        # HetLinear #2 (bias omitted, same reason)
        h2 = mm(h, w2_ref[i])                      # [N, H] f32
        o_ref[i] = bn(h2, g2, be2).astype(o_ref.dtype)


def student_forward(x, w1, w2, g1, be1, g2, be2, *,
                    types_per_block=2, compute_dtype=jnp.float32):
    """x: [T, N, Fin]; returns [T, N, H].

    types_per_block=2 -> grid=(T//2,): 2-way parallel grid keeps both v7x
    TensorCores busy while halving grid-step overhead on single-core v5e/v6e.
    Use types_per_block=T to fully collapse the grid on v5e/v6e.
    """
    T, N, Fin = x.shape
    H = w1.shape[-1]
    assert T % types_per_block == 0, "T must be divisible by types_per_block"
    tpb = types_per_block

    kernel = functools.partial(student_kernel,
                               types_per_block=tpb,
                               compute_dtype=compute_dtype)

    grid_spec = pltpu.PrefetchScalarGridSpec(
        num_scalar_prefetch=0,
        grid=(T // tpb,),
        in_specs=[
            pl.BlockSpec((tpb, N, Fin), lambda t: (t, 0, 0)),   # x   (per type)
            pl.BlockSpec((tpb, Fin, H), lambda t: (t, 0, 0)),   # W1  (per type)
            pl.BlockSpec((tpb, H, H), lambda t: (t, 0, 0)),     # W2  (per type)
            pl.BlockSpec((1, H), lambda t: (0, 0)),             # gamma1 (shared)
            pl.BlockSpec((1, H), lambda t: (0, 0)),             # beta1  (shared)
            pl.BlockSpec((1, H), lambda t: (0, 0)),             # gamma2 (shared)
            pl.BlockSpec((1, H), lambda t: (0, 0)),             # beta2  (shared)
        ],
        out_specs=pl.BlockSpec((tpb, N, H), lambda t: (t, 0, 0)),
    )

    return pl.pallas_call(
        kernel,
        out_shape=jax.ShapeDtypeStruct((T, N, H), jnp.float32),
        grid_spec=grid_spec,
        compiler_params=pltpu.CompilerParams(
            dimension_semantics=("parallel",)),
    )(x, w1, w2, g1, be1, g2, be2)


def student_reference(x, w1, b1, w2, b2, g1, be1, g2, be2):
    """Pure-JAX reference mirroring the PyTorch module (biases included)."""
    def bn(h, g, b):
        m = jnp.mean(h, axis=0, keepdims=True)
        v = jnp.mean((h - m) ** 2, axis=0, keepdims=True)
        return g * (h - m) * jax.lax.rsqrt(v + EPS) + b

    outs = []
    for t in range(x.shape[0]):
        h = x[t] @ w1[t] + b1[t]
        h = bn(h, g1[0], be1[0])
        h = h @ w2[t] + b2[t]
        h = bn(h, g2[0], be2[0])
        outs.append(h)
    return jnp.stack(outs, axis=0)


if __name__ == "__main__":
    T = 4      # node types
    N = 8      # nodes per type
    Fin = 32   # input feature dim (lazy `input_features=-1` resolved here)
    H = 128    # out_dim of both HetLinears / BatchNorm width

    key = jax.random.PRNGKey(0)
    kx, kw1, kb1, kw2, kb2, kg1, kbe1, kg2, kbe2 = jax.random.split(key, 9)

    x = jax.random.normal(kx, (T, N, Fin), dtype=jnp.float32)

    # Per-type Linear weights; biases only feed the reference (the kernel drops
    # them since training-mode BN cancels them exactly). Shared BN affines.
    w1 = jax.random.normal(kw1, (T, Fin, H), dtype=jnp.float32) * 0.1
    b1 = jax.random.normal(kb1, (T, H), dtype=jnp.float32) * 0.1
    w2 = jax.random.normal(kw2, (T, H, H), dtype=jnp.float32) * 0.1
    b2 = jax.random.normal(kb2, (T, H), dtype=jnp.float32) * 0.1
    g1 = 1.0 + 0.1 * jax.random.normal(kg1, (1, H), dtype=jnp.float32)
    be1 = 0.1 * jax.random.normal(kbe1, (1, H), dtype=jnp.float32)
    g2 = 1.0 + 0.1 * jax.random.normal(kg2, (1, H), dtype=jnp.float32)
    be2 = 0.1 * jax.random.normal(kbe2, (1, H), dtype=jnp.float32)

    ref = student_reference(x, w1, b1, w2, b2, g1, be1, g2, be2)

    # f32 path (default): tight check against the bias-including reference.
    out = student_forward(x, w1, w2, g1, be1, g2, be2)
    out = jax.block_until_ready(out)
    assert out.shape == (T, N, H)
    assert jnp.allclose(out, ref, atol=2e-4, rtol=2e-4), "f32 mismatch vs ref"

    # bf16-matmul path (MXU-native on v5e/v6e/v7x); BN stats stay in f32, so
    # the renormalized output is close — loose tolerance only.
    out_bf16 = student_forward(x, w1, w2, g1, be1, g2, be2,
                               compute_dtype=jnp.bfloat16)
    out_bf16 = jax.block_until_ready(out_bf16)
    assert jnp.allclose(out_bf16, ref, atol=1e-1, rtol=1e-1), "bf16 mismatch"

    print("KERNEL_OK")
</pallas_src>

<mosaic_0001>
module attributes {stable_mosaic.version = 11 : i64} {
  func.func @student_kernel(%arg0: i32, %arg1: memref<2x8x32xf32, #tpu.memory_space<vmem>>, %arg2: memref<2x32x128xf32, #tpu.memory_space<vmem>>, %arg3: memref<2x128x128xf32, #tpu.memory_space<vmem>>, %arg4: memref<1x128xf32, #tpu.memory_space<vmem>>, %arg5: memref<1x128xf32, #tpu.memory_space<vmem>>, %arg6: memref<1x128xf32, #tpu.memory_space<vmem>>, %arg7: memref<1x128xf32, #tpu.memory_space<vmem>>, %arg8: memref<2x8x128xf32, #tpu.memory_space<vmem>>) attributes {dimension_semantics = [#tpu.dimension_semantics<parallel>], iteration_bounds = array<i64: 2>, scalar_prefetch = 0 : i64, scratch_operands = 0 : i64, tpu.core_type = #tpu.core_type<tc>, window_params = [{transform_indices = @transform_0, window_bounds = array<i64: 2, 8, 32>}, {transform_indices = @transform_1, window_bounds = array<i64: 2, 32, 128>}, {transform_indices = @transform_2, window_bounds = array<i64: 2, 128, 128>}, {pipeline_mode = #tpu.pipeline_mode<synchronous>, transform_indices = @transform_3, window_bounds = array<i64: 1, 128>}, {pipeline_mode = #tpu.pipeline_mode<synchronous>, transform_indices = @transform_4, window_bounds = array<i64: 1, 128>}, {pipeline_mode = #tpu.pipeline_mode<synchronous>, transform_indices = @transform_5, window_bounds = array<i64: 1, 128>}, {pipeline_mode = #tpu.pipeline_mode<synchronous>, transform_indices = @transform_6, window_bounds = array<i64: 1, 128>}, {transform_indices = @transform_7, window_bounds = array<i64: 2, 8, 128>}]} {
    %c0 = arith.constant 0 : index
    %c0_0 = arith.constant 0 : index
    %0 = vector.load %arg4[%c0, %c0_0] : memref<1x128xf32, #tpu.memory_space<vmem>>, vector<1x128xf32>
    %c0_1 = arith.constant 0 : index
    %c0_2 = arith.constant 0 : index
    %1 = vector.load %arg5[%c0_1, %c0_2] : memref<1x128xf32, #tpu.memory_space<vmem>>, vector<1x128xf32>
    %c0_3 = arith.constant 0 : index
    %c0_4 = arith.constant 0 : index
    %2 = vector.load %arg6[%c0_3, %c0_4] : memref<1x128xf32, #tpu.memory_space<vmem>>, vector<1x128xf32>
    %c0_5 = arith.constant 0 : index
    %c0_6 = arith.constant 0 : index
    %3 = vector.load %arg7[%c0_5, %c0_6] : memref<1x128xf32, #tpu.memory_space<vmem>>, vector<1x128xf32>
    %c0_7 = arith.constant 0 : index
    %c0_8 = arith.constant 0 : index
    %c0_9 = arith.constant 0 : index
    %4 = vector.load %arg1[%c0_7, %c0_8, %c0_9] : memref<2x8x32xf32, #tpu.memory_space<vmem>>, vector<1x8x32xf32>
    %5 = vector.shape_cast %4 : vector<1x8x32xf32> to vector<8x32xf32>
    %c0_10 = arith.constant 0 : index
    %c0_11 = arith.constant 0 : index
    %c0_12 = arith.constant 0 : index
    %6 = vector.load %arg2[%c0_10, %c0_11, %c0_12] : memref<2x32x128xf32, #tpu.memory_space<vmem>>, vector<1x32x128xf32>
    %7 = vector.shape_cast %6 : vector<1x32x128xf32> to vector<32x128xf32>
    %cst = arith.constant dense<0.000000e+00> : vector<8x128xf32>
    %8 = tpu.matmul %5, %7, %cst {dimension_numbers = #tpu.dot_dimension_numbers<[1], [0], [0], [1], [0, 0, 1, 1], [], []>} : vector<8x32xf32>, vector<32x128xf32>, vector<8x128xf32> -> vector<8x128xf32>
    %cst_13 = arith.constant dense<0.000000e+00> : vector<128xf32>
    %9 = vector.multi_reduction <add>, %8, %cst_13 [0] : vector<8x128xf32> to vector<128xf32>
    %10 = vector.shape_cast %9 : vector<128xf32> to vector<1x128xf32>
    %cst_14 = arith.constant 8.000000e+00 : f32
    %11 = vector.broadcast %cst_14 : f32 to vector<1x128xf32>
    %12 = arith.divf %10, %11 : vector<1x128xf32>
    %13 = arith.mulf %8, %8 : vector<8x128xf32>
    %cst_15 = arith.constant dense<0.000000e+00> : vector<128xf32>
    %14 = vector.multi_reduction <add>, %13, %cst_15 [0] : vector<8x128xf32> to vector<128xf32>
    %15 = vector.shape_cast %14 : vector<128xf32> to vector<1x128xf32>
    %cst_16 = arith.constant 8.000000e+00 : f32
    %16 = vector.broadcast %cst_16 : f32 to vector<1x128xf32>
    %17 = arith.divf %15, %16 : vector<1x128xf32>
    %18 = arith.mulf %12, %12 : vector<1x128xf32>
    %19 = arith.subf %17, %18 : vector<1x128xf32>
    %cst_17 = arith.constant 9.99999974E-6 : f32
    %20 = vector.broadcast %cst_17 : f32 to vector<1x128xf32>
    %21 = arith.addf %19, %20 : vector<1x128xf32>
    %22 = math.rsqrt %21 : vector<1x128xf32>
    %23 = arith.mulf %0, %22 : vector<1x128xf32>
    %24 = arith.mulf %23, %12 : vector<1x128xf32>
    %25 = arith.subf %1, %24 : vector<1x128xf32>
    %26 = vector.broadcast %23 : vector<1x128xf32> to vector<8x128xf32>
    %27 = arith.mulf %8, %26 : vector<8x128xf32>
    %28 = vector.broadcast %25 : vector<1x128xf32> to vector<8x128xf32>
    %29 = arith.addf %27, %28 : vector<8x128xf32>
    %c0_18 = arith.constant 0 : index
    %c0_19 = arith.constant 0 : index
    %c0_20 = arith.constant 0 : index
    %30 = vector.load %arg3[%c0_18, %c0_19, %c0_20] : memref<2x128x128xf32, #tpu.memory_space<vmem>>, vector<1x128x128xf32>
    %31 = vector.shape_cast %30 : vector<1x128x128xf32> to vector<128x128xf32>
    %cst_21 = arith.constant dense<0.000000e+00> : vector<8x128xf32>
    %32 = tpu.matmul %29, %31, %cst_21 {dimension_numbers = #tpu.dot_dimension_numbers<[1], [0], [0], [1], [0, 0, 1, 1], [], []>} : vector<8x128xf32>, vector<128x128xf32>, vector<8x128xf32> -> vector<8x128xf32>
    %cst_22 = arith.constant dense<0.000000e+00> : vector<128xf32>
    %33 = vector.multi_reduction <add>, %32, %cst_22 [0] : vector<8x128xf32> to vector<128xf32>
    %34 = vector.shape_cast %33 : vector<128xf32> to vector<1x128xf32>
    %cst_23 = arith.constant 8.000000e+00 : f32
    %35 = vector.broadcast %cst_23 : f32 to vector<1x128xf32>
    %36 = arith.divf %34, %35 : vector<1x128xf32>
    %37 = arith.mulf %32, %32 : vector<8x128xf32>
    %cst_24 = arith.constant dense<0.000000e+00> : vector<128xf32>
    %38 = vector.multi_reduction <add>, %37, %cst_24 [0] : vector<8x128xf32> to vector<128xf32>
    %39 = vector.shape_cast %38 : vector<128xf32> to vector<1x128xf32>
    %cst_25 = arith.constant 8.000000e+00 : f32
    %40 = vector.broadcast %cst_25 : f32 to vector<1x128xf32>
    %41 = arith.divf %39, %40 : vector<1x128xf32>
    %42 = arith.mulf %36, %36 : vector<1x128xf32>
    %43 = arith.subf %41, %42 : vector<1x128xf32>
    %cst_26 = arith.constant 9.99999974E-6 : f32
    %44 = vector.broadcast %cst_26 : f32 to vector<1x128xf32>
    %45 = arith.addf %43, %44 : vector<1x128xf32>
    %46 = math.rsqrt %45 : vector<1x128xf32>
    %47 = arith.mulf %2, %46 : vector<1x128xf32>
    %48 = arith.mulf %47, %36 : vector<1x128xf32>
    %49 = arith.subf %3, %48 : vector<1x128xf32>
    %50 = vector.broadcast %47 : vector<1x128xf32> to vector<8x128xf32>
    %51 = arith.mulf %32, %50 : vector<8x128xf32>
    %52 = vector.broadcast %49 : vector<1x128xf32> to vector<8x128xf32>
    %53 = arith.addf %51, %52 : vector<8x128xf32>
    %c0_27 = arith.constant 0 : index
    %c0_28 = arith.constant 0 : index
    %c0_29 = arith.constant 0 : index
    %54 = vector.load %arg8[%c0_27, %c0_28, %c0_29] : memref<2x8x128xf32, #tpu.memory_space<vmem>>, vector<1x8x128xf32>
    %55 = vector.shape_cast %54 : vector<1x8x128xf32> to vector<8x128xf32>
    %56 = vector.shape_cast %53 : vector<8x128xf32> to vector<1x8x128xf32>
    tpu.vector_store %arg8[%c0_27, %c0_28, %c0_29], %56 {strides = array<i32>} : memref<2x8x128xf32, #tpu.memory_space<vmem>>, vector<1x8x128xf32>,
    %c1 = arith.constant 1 : index
    %c0_30 = arith.constant 0 : index
    %c0_31 = arith.constant 0 : index
    %57 = vector.load %arg1[%c1, %c0_30, %c0_31] : memref<2x8x32xf32, #tpu.memory_space<vmem>>, vector<1x8x32xf32>
    %58 = vector.shape_cast %57 : vector<1x8x32xf32> to vector<8x32xf32>
    %c1_32 = arith.constant 1 : index
    %c0_33 = arith.constant 0 : index
    %c0_34 = arith.constant 0 : index
    %59 = vector.load %arg2[%c1_32, %c0_33, %c0_34] : memref<2x32x128xf32, #tpu.memory_space<vmem>>, vector<1x32x128xf32>
    %60 = vector.shape_cast %59 : vector<1x32x128xf32> to vector<32x128xf32>
    %cst_35 = arith.constant dense<0.000000e+00> : vector<8x128xf32>
    %61 = tpu.matmul %58, %60, %cst_35 {dimension_numbers = #tpu.dot_dimension_numbers<[1], [0], [0], [1], [0, 0, 1, 1], [], []>} : vector<8x32xf32>, vector<32x128xf32>, vector<8x128xf32> -> vector<8x128xf32>
    %cst_36 = arith.constant dense<0.000000e+00> : vector<128xf32>
    %62 = vector.multi_reduction <add>, %61, %cst_36 [0] : vector<8x128xf32> to vector<128xf32>
    %63 = vector.shape_cast %62 : vector<128xf32> to vector<1x128xf32>
    %cst_37 = arith.constant 8.000000e+00 : f32
    %64 = vector.broadcast %cst_37 : f32 to vector<1x128xf32>
    %65 = arith.divf %63, %64 : vector<1x128xf32>
    %66 = arith.mulf %61, %61 : vector<8x128xf32>
    %cst_38 = arith.constant dense<0.000000e+00> : vector<128xf32>
    %67 = vector.multi_reduction <add>, %66, %cst_38 [0] : vector<8x128xf32> to vector<128xf32>
    %68 = vector.shape_cast %67 : vector<128xf32> to vector<1x128xf32>
    %cst_39 = arith.constant 8.000000e+00 : f32
    %69 = vector.broadcast %cst_39 : f32 to vector<1x128xf32>
    %70 = arith.divf %68, %69 : vector<1x128xf32>
    %71 = arith.mulf %65, %65 : vector<1x128xf32>
    %72 = arith.subf %70, %71 : vector<1x128xf32>
    %cst_40 = arith.constant 9.99999974E-6 : f32
    %73 = vector.broadcast %cst_40 : f32 to vector<1x128xf32>
    %74 = arith.addf %72, %73 : vector<1x128xf32>
    %75 = math.rsqrt %74 : vector<1x128xf32>
    %76 = arith.mulf %0, %75 : vector<1x128xf32>
    %77 = arith.mulf %76, %65 : vector<1x128xf32>
    %78 = arith.subf %1, %77 : vector<1x128xf32>
    %79 = vector.broadcast %76 : vector<1x128xf32> to vector<8x128xf32>
    %80 = arith.mulf %61, %79 : vector<8x128xf32>
    %81 = vector.broadcast %78 : vector<1x128xf32> to vector<8x128xf32>
    %82 = arith.addf %80, %81 : vector<8x128xf32>
    %c1_41 = arith.constant 1 : index
    %c0_42 = arith.constant 0 : index
    %c0_43 = arith.constant 0 : index
    %83 = vector.load %arg3[%c1_41, %c0_42, %c0_43] : memref<2x128x128xf32, #tpu.memory_space<vmem>>, vector<1x128x128xf32>
    %84 = vector.shape_cast %83 : vector<1x128x128xf32> to vector<128x128xf32>
    %cst_44 = arith.constant dense<0.000000e+00> : vector<8x128xf32>
    %85 = tpu.matmul %82, %84, %cst_44 {dimension_numbers = #tpu.dot_dimension_numbers<[1], [0], [0], [1], [0, 0, 1, 1], [], []>} : vector<8x128xf32>, vector<128x128xf32>, vector<8x128xf32> -> vector<8x128xf32>
    %cst_45 = arith.constant dense<0.000000e+00> : vector<128xf32>
    %86 = vector.multi_reduction <add>, %85, %cst_45 [0] : vector<8x128xf32> to vector<128xf32>
    %87 = vector.shape_cast %86 : vector<128xf32> to vector<1x128xf32>
    %cst_46 = arith.constant 8.000000e+00 : f32
    %88 = vector.broadcast %cst_46 : f32 to vector<1x128xf32>
    %89 = arith.divf %87, %88 : vector<1x128xf32>
    %90 = arith.mulf %85, %85 : vector<8x128xf32>
    %cst_47 = arith.constant dense<0.000000e+00> : vector<128xf32>
    %91 = vector.multi_reduction <add>, %90, %cst_47 [0] : vector<8x128xf32> to vector<128xf32>
    %92 = vector.shape_cast %91 : vector<128xf32> to vector<1x128xf32>
    %cst_48 = arith.constant 8.000000e+00 : f32
    %93 = vector.broadcast %cst_48 : f32 to vector<1x128xf32>
    %94 = arith.divf %92, %93 : vector<1x128xf32>
    %95 = arith.mulf %89, %89 : vector<1x128xf32>
    %96 = arith.subf %94, %95 : vector<1x128xf32>
    %cst_49 = arith.constant 9.99999974E-6 : f32
    %97 = vector.broadcast %cst_49 : f32 to vector<1x128xf32>
    %98 = arith.addf %96, %97 : vector<1x128xf32>
    %99 = math.rsqrt %98 : vector<1x128xf32>
    %100 = arith.mulf %2, %99 : vector<1x128xf32>
    %101 = arith.mulf %100, %89 : vector<1x128xf32>
    %102 = arith.subf %3, %101 : vector<1x128xf32>
    %103 = vector.broadcast %100 : vector<1x128xf32> to vector<8x128xf32>
    %104 = arith.mulf %85, %103 : vector<8x128xf32>
    %105 = vector.broadcast %102 : vector<1x128xf32> to vector<8x128xf32>
    %106 = arith.addf %104, %105 : vector<8x128xf32>
    %c1_50 = arith.constant 1 : index
    %c0_51 = arith.constant 0 : index
    %c0_52 = arith.constant 0 : index
    %107 = vector.load %arg8[%c1_50, %c0_51, %c0_52] : memref<2x8x128xf32, #tpu.memory_space<vmem>>, vector<1x8x128xf32>
    %108 = vector.shape_cast %107 : vector<1x8x128xf32> to vector<8x128xf32>
    %109 = vector.shape_cast %106 : vector<8x128xf32> to vector<1x8x128xf32>
    tpu.vector_store %arg8[%c1_50, %c0_51, %c0_52], %109 {strides = array<i32>} : memref<2x8x128xf32, #tpu.memory_space<vmem>>, vector<1x8x128xf32>,
    return
  }
  func.func @transform_0(%arg0: i32) -> (i32, i32, i32) {
    %c0_i32 = arith.constant 0 : i32
    %c0_i32_0 = arith.constant 0 : i32
    %c0_i32_1 = arith.constant 0 : i32
    return %arg0, %c0_i32, %c0_i32_0 : i32, i32, i32
  }
  func.func @transform_1(%arg0: i32) -> (i32, i32, i32) {
    %c0_i32 = arith.constant 0 : i32
    %c0_i32_0 = arith.constant 0 : i32
    %c0_i32_1 = arith.constant 0 : i32
    return %arg0, %c0_i32, %c0_i32_0 : i32, i32, i32
  }
  func.func @transform_2(%arg0: i32) -> (i32, i32, i32) {
    %c0_i32 = arith.constant 0 : i32
    %c0_i32_0 = arith.constant 0 : i32
    %c0_i32_1 = arith.constant 0 : i32
    return %arg0, %c0_i32, %c0_i32_0 : i32, i32, i32
  }
  func.func @transform_3(%arg0: i32) -> (i32, i32) {
    %c0_i32 = arith.constant 0 : i32
    %c0_i32_0 = arith.constant 0 : i32
    %c0_i32_1 = arith.constant 0 : i32
    return %c0_i32, %c0_i32_0 : i32, i32
  }
  func.func @transform_4(%arg0: i32) -> (i32, i32) {
    %c0_i32 = arith.constant 0 : i32
    %c0_i32_0 = arith.constant 0 : i32
    %c0_i32_1 = arith.constant 0 : i32
    return %c0_i32, %c0_i32_0 : i32, i32
  }
  func.func @transform_5(%arg0: i32) -> (i32, i32) {
    %c0_i32 = arith.constant 0 : i32
    %c0_i32_0 = arith.constant 0 : i32
    %c0_i32_1 = arith.constant 0 : i32
    return %c0_i32, %c0_i32_0 : i32, i32
  }
  func.func @transform_6(%arg0: i32) -> (i32, i32) {
    %c0_i32 = arith.constant 0 : i32
    %c0_i32_0 = arith.constant 0 : i32
    %c0_i32_1 = arith.constant 0 : i32
    return %c0_i32, %c0_i32_0 : i32, i32
  }
  func.func @transform_7(%arg0: i32) -> (i32, i32, i32) {
    %c0_i32 = arith.constant 0 : i32
    %c0_i32_0 = arith.constant 0 : i32
    %c0_i32_1 = arith.constant 0 : i32
    return %arg0, %c0_i32, %c0_i32_0 : i32, i32, i32
  }
}

</mosaic_0001>

<bundles_post_ra>
// kernel: tpu_custom_call.1
= control target key start
LH: loop header
LB: loop body
LE: loop exit
PB: predicated region body
PF: predicated region fallthrough
CT: control target
= control target key end

     0   :  { %s1419_s0 = inlined_call_operand.hbm [shape: f32[4,8,32], index: 0, kind: input, shape index: {}]   ;;  %s1420_s1 = inlined_call_operand.hbm [shape: f32[4,32,128], index: 1, kind: input, shape index: {}]   ;;  %s1421_s2 = inlined_call_operand.hbm [shape: f32[4,128,128], index: 2, kind: input, shape index: {}]   ;;  %s1422_s3 = inlined_call_operand.vmem [shape: f32[1,128], index: 3, kind: input, shape index: {}]   ;;  %s1423_s4 = inlined_call_operand.vmem [shape: f32[1,128], index: 4, kind: input, shape index: {}]   ;;  %s1424_s5 = inlined_call_operand.vmem [shape: f32[1,128], index: 5, kind: input, shape index: {}]   ;;  %s1425_s6 = inlined_call_operand.vmem [shape: f32[1,128], index: 6, kind: input, shape index: {}]   ;;  %s1426_s7 = inlined_call_operand.hbm [shape: f32[4,8,128], index: 7, kind: output, shape index: {}]  }
   0x1   :  { %1436 = sst [smem:[#allocation17_spill]] %s1420_s1 }
   0x2   :  { %12 = vsyncpa [#allocation3], 0 }
   0x3   :  { %14 = vsyncpa [#allocation3 + $0x1], 0 }
   0x4   :  { %15 = vsyncpa [#allocation6], 0 }
   0x5   :  { %17 = vsyncpa [#allocation6 + $0x1], 0 }
   0x6   :  { %18 = vsyncpa [#allocation4], 0 }
   0x7   :  { %20 = vsyncpa [#allocation4 + $0x1], 0  ;;  %s1152_s24 = smov 0   ;;  %s1154_s25 = smov 0  }
   0x8   :  { %s1156_s26 = smov 0   ;;  %s1158_s27 = smov 0  }
   0x9 LB: > { %1437 = sst [smem:[#allocation12_spill]] %s1093_s24  ;;  %s1173_s28 = sadd.s32 4294967295, %s1105_s27   ;;  %s1105_s27 = sphi %s1158_s27, %s1452_s27   ;;  %s1101_s26 = sphi %s1156_s26, %s1454_s26   ;;  %s1097_s25 = sphi %s1154_s25, %s1456_s25   ;;  %s1093_s24 = sphi %s1152_s24, %s1455_s24  }
   0xa   : > { %1438 = sst [smem:[#allocation13_spill]] %s1101_s26  ;;  %s820_s29 = sadd.s32 4294967294, %s1105_s27  }
   0xb   : > { %s1177_s30 = sadd.s32 1, %s1105_s27   ;;  %s33_s8 = sadd.s32 1, %s1101_s26 }
   0xc   : > { %1439 = sst [smem:[#allocation14_spill]] %s1177_s30  ;;  %s30_s9 = ssub.s32 %s1105_s27, %s1177_s30 }
   0xd   : > { %p40_p0 = scmp.ne.s32.totalorder %s1101_s26, %s1097_s25  ;;  %p31_p1 = scmp.eq.s32.totalorder %s30_s9, 0 }
   0xe   : > { %p41_p2 = scmp.eq.s32.totalorder %s1105_s27, 0  ;;  %p46_p3 = scmp.ne.s32.totalorder %s1097_s25, %s1093_s24 }
   0xf   : > { %p47_p4 = scmp.eq.s32.totalorder %s1173_s28, 0  ;;  %p206_p7 = scmp.eq.s32.totalorder %s1173_s28, 1 }
  0x10   : > { %s1189_s10 = scalar_select %p31_p1, %s1101_s26, %s33_s8  }
  0x11   : > { %p42_p5 = por %p41_p2, %p40_p0  ;;  %p1191_p6 = por %p47_p4, %p46_p3 }
  0x12   : > { %1440 = sst [smem:[#allocation15_spill]] %s1189_s10  ;;  %p212_p8 = scmp.eq.s32.totalorder %s820_s29, 1 }
  0x13   : > { %p822_p9 = scmp.ge.s32.totalorder %s1105_s27, 2  ;;  %p896_p10 = scmp.lt.s32.totalorder %s1105_s27, 2 }
  0x14   : > { %p1198_p11 = por %p206_p7, %p40_p0  ;;  %p1202_p12 = por %p212_p8, %p46_p3 }
  0x15   : > { %s1207_s14 = sand.u32 1, %s1101_s26   ;;  %p1209_p13 = pnand %p896_p10, %p42_p5 }
  0x16   : > { %s1443_s13 = scalar_select %p1202_p12, 1, 0 }
  0x17   : > { %s266_s16 = sand.u32 1, %s1105_s27   ;;  %s826_s17 = sshll.u32 %s1207_s14, 6 }
  0x18   : > { %1444 = sst [smem:[#allocation16_spill]] %s1443_s13  ;;  %s870_s18 = sshll.u32 %s1105_s27, 6 }
  0x19   : > { %s1446_s1 = sld [smem:[#allocation17_spill]]  ;;  %s270_s22 = scalar_lea.vmem [#allocation5], %s826_s17 }
  0x1a   : > { %s279_s23 = sshll.u32 %s270_s22, 4  ;;  %p834_p0 = scmp.ge.s32.totalorder %s1105_s27, 1  ;;  %s280_s23 = int_to_ptr.vmem [resolvable:$true] %s279_s23 }
  0x1b   : > { %s1220_s8 = scalar_lea.sflag [#allocation6], %s266_s16  ;;  %p949_p2 = pneg %p1209_p13 }
  0x1f   : > { %s276_s21 = scalar_lea.hbm %s1446_s1, %s870_s18  ;;  %s952_s17 = scalar_lea.hbm %s1446_s1, 128 }
  0x20   : > { %s277_s29 = sshll.u32 %s276_s21, 4  ;;  %s278_s29 = int_to_ptr.hbm [resolvable:$true] %s277_s29 }
  0x21   : > { %s945_s9 = sshra.s32 %s278_s29, 4  ;;  %s946_s9 = int_to_ptr.hbm [resolvable:$true] %s945_s9 }
  0x22   : > { %s947_s10 = scalar_lea.hbm %s946_s9, 64  ;;  %p953_p5 = scmp.lt.s32.totalorder %s946_s9, %s1446_s1 }
  0x23   : > { %p948_p1 = scmp.ne.s32.totalorder %s946_s9, %s947_s10  ;;  %p954_p7 = scmp.lt.s32.totalorder %s952_s17, %s947_s10 }
  0x25   : > { %p950_p3 = pnand %p949_p2, %p948_p1  ;;  %p955_p8 = por %p954_p7, %p953_p5 }
  0x27   : > { %p951_p4 = pneg %p950_p3 }
  0x29   : > { %p956_p10 = pnand %p955_p8, %p951_p4 }
  0x2b   : > { %959 = shalt.err (!%p956_p10)
}
  0x2c   : > { %s1430_s16 = smov 128   ;;  %s1432_s22 = smov 8  }
  0x2d   : > { %888 = dma.hbm_to_vmem [thread:$0]  (!%p1209_p13), %s278_s29, 1024, %s280_s23, %s1220_s8, %s1430_s16, %s1430_s16, %s1432_s22  }
  0x2e   : > { %p310_p1 = scmp.lt.s32.totalorder %s1105_s27, 3  ;;  %s823_s10 = sshll.u32 %s1207_s14, 4 }
  0x2f   : > { %s868_s9 = sshll.u32 %s1105_s27, 4  ;;  %s248_s21 = scalar_lea.vmem [#allocation2], %s823_s10 }
  0x30   : > { %p1244_p3 = pnand %p834_p0, %p310_p1  ;;  %s253_s20 = scalar_lea.hbm %s1419_s0, %s868_s9 }
  0x31   : > { %s256_s1 = sshll.u32 %s248_s21, 4  ;;  %s254_s26 = sshll.u32 %s253_s20, 4  ;;  %s257_s1 = int_to_ptr.vmem [resolvable:$true] %s256_s1  ;;  %s255_s26 = int_to_ptr.hbm [resolvable:$true] %s254_s26 }
  0x32   : > { %s830_s30 = sshll.u32 %s1207_s14, 8  ;;  %s245_s23 = scalar_lea.sflag [#allocation3], %s1207_s14 }
  0x33   : > { %s975_s29 = sshra.s32 %s255_s26, 4  ;;  %s982_s18 = scalar_lea.hbm %s1419_s0, 32  ;;  %s976_s29 = int_to_ptr.hbm [resolvable:$true] %s975_s29 }
  0x34   : > { %s977_s16 = scalar_lea.hbm %s976_s29, 16  ;;  %p983_p7 = scmp.lt.s32.totalorder %s976_s29, %s1419_s0 }
  0x35   : > { %p978_p4 = scmp.ne.s32.totalorder %s976_s29, %s977_s16  ;;  %p984_p8 = scmp.lt.s32.totalorder %s982_s18, %s977_s16 }
  0x37   : > { %p980_p0 = pnand %p978_p4, %p949_p2  ;;  %p985_p10 = por %p984_p8, %p983_p7 }
  0x39   : > { %p981_p5 = pneg %p980_p0 }
  0x3b   : > { %p986_p1 = pnand %p985_p10, %p981_p5 }
  0x3d   : > { %989 = shalt.err (!%p986_p1)
}
  0x3e   : > { %s1448_s14 = smov 8   ;;  %s1449_s17 = smov 128  }
  0x3f   : > { %885 = dma.hbm_to_vmem [thread:$0]  (!%p1209_p13), %s255_s26, 256, %s257_s1, %s245_s23, %s1449_s17, %s1449_s17, %s1448_s14  }
  0x40   : > { %s872_s20 = sshll.u32 %s1105_s27, 8  ;;  %s293_s24 = scalar_lea.vmem [#allocation7], %s830_s30 }
  0x41   : > { %s299_s22 = scalar_lea.hbm %s1421_s2, %s872_s20  ;;  %s302_s9 = sshll.u32 %s293_s24, 4  ;;  %s303_s9 = int_to_ptr.vmem [resolvable:$true] %s302_s9 }
  0x42   : > { %s300_s29 = sshll.u32 %s299_s22, 4  ;;  %s1012_s26 = scalar_lea.hbm %s1421_s2, 512  ;;  %s301_s29 = int_to_ptr.hbm [resolvable:$true] %s300_s29 }
  0x43   : > { %s1005_s16 = sshra.s32 %s301_s29, 4  ;;  %s1006_s16 = int_to_ptr.hbm [resolvable:$true] %s1005_s16 }
  0x44   : > { %s1007_s18 = scalar_lea.hbm %s1006_s16, 256  ;;  %p1013_p7 = scmp.lt.s32.totalorder %s1006_s16, %s1421_s2 }
  0x45   : > { %p1008_p4 = scmp.ne.s32.totalorder %s1006_s16, %s1007_s18  ;;  %p1014_p8 = scmp.lt.s32.totalorder %s1012_s26, %s1007_s18 }
  0x47   : > { %p1010_p0 = pnand %p1008_p4, %p949_p2  ;;  %p1015_p10 = por %p1014_p8, %p1013_p7 }
  0x49   : > { %p1011_p5 = pneg %p1010_p0 }
  0x4b   : > { %p1016_p1 = pnand %p1015_p10, %p1011_p5 }
  0x4d   : > { %1019 = shalt.err (!%p1016_p1)
}
  0x4e   : > { %891 = dma.hbm_to_vmem [thread:$0]  (!%p1209_p13), %s301_s29, 4096, %s303_s9, %s1220_s8, %s1449_s17, %s1449_s17, %s1448_s14  }
  0x4f   : > { %314 = sbr.rel (%p1244_p3) target bundleno = 461 (0x1cd), region = 48  ;;  %s1289_s24 = sand.u32 (!%p1244_p3), 1, %s1097_s25  }
  0x50   : > { %s835_s30 = sshll.u32 (!%p1244_p3), %s1289_s24, 4  ;;  %s317_s20 = scalar_lea.sflag (!%p1244_p3), [#allocation3], %s1289_s24 }
  0x51   : > { %s320_s13 = scalar_lea.vmem (!%p1244_p3), [#allocation2], %s835_s30 }
  0x54   : > { %1080 = dma.done.wait (%p1191_p6), %s317_s20, 256  }
  0x55   : > { %1082 = vsyncadd (%p1191_p6), %s317_s20, 4294967040  ;;  %s326_s15 = sand.u32 1, %s1173_s28   ;;  %s836_s8 = sshll.u32 %s1289_s24, 6 }
  0x56   : > { %s327_s19 = scalar_lea.sflag [#allocation6], %s326_s15  ;;  %s330_s14 = scalar_lea.vmem [#allocation5], %s836_s8 }
  0x57   : > { %1084 = dma.done.wait (%p1191_p6), %s327_s19, 5120  }
  0x58   : > { %1086 = vsyncadd (%p1191_p6), %s327_s19, 4294962176  ;;  %v394_v0 = vld [vmem:[%s330_s14 + $0x18] sm:$0xff]  ;;  %v393_v2 = vld [vmem:[%s330_s14 + $0x10] sm:$0xff]  ;;  %vm395_vm0 = vcmask 261120   ;;  %s837_s11 = sshll.u32 %s1289_s24, 8  ;;  %v1109_v10 = vmov 8.0  }
  0x59   : > { %v844_v1 = vld [vmem:[%s330_s14 + $0x38] sm:$0xff]  ;;  %411 = vmatpush.msra.mxu0 %v394_v0  ;;  %v843_v3 = vld [vmem:[%s330_s14 + $0x30] sm:$0xff]  ;;  %v392_v4 = vld [vmem:[%s330_s14 + $0x8] sm:$0xff]  ;;  %935 = vrcp.f32 %v1109_v10  ;;  %s1306_s17 = scalar_lea.vmem [#allocation7], %s837_s11  ;;  %s381_s23 = scalar_lea.vmem [#allocation8], %s835_s30 }
  0x5a   : > { %563 = vmatpush.msra.mxu2 %v844_v1  ;;  %v842_v5 = vld [vmem:[%s330_s14 + $0x28] sm:$0xff]  ;;  %v391_v6 = vld [vmem:[%s330_s14] sm:$0xff]  ;;  %v480_v11 = vld [vmem:[%s1306_s17 + $0x78] sm:$0xff]  ;;  %s873_s21 = sshll.u32 %s1173_s28, 4  ;;  %s701_s8 = sshll.u32 %s381_s23, 4  ;;  %s702_s8 = int_to_ptr.vmem [resolvable:$true] %s701_s8 }
  0x5b   : > { %412 = vmatpush.msra.mxu0 %v393_v2  ;;  %v841_v7 = vld [vmem:[%s330_s14 + $0x20] sm:$0xff]  ;;  %v840_v9 = vld [vmem:[%s320_s13 + $0x8] sm:$0xff]  ;;  %481 = vmatpush.msra.mxu1 %v480_v11  ;;  %v479_v12 = vld [vmem:[%s1306_s17 + $0x70] sm:$0xff]  ;;  %s700_s15 = scalar_lea.hbm %s1426_s7, %s873_s21  ;;  %s689_s28 = scalar_lea.sflag [#allocation4], %s1289_s24 }
  0x5c   : > { %564 = vmatpush.msra.mxu2 %v843_v3  ;;  %v390_v8 = vld [vmem:[%s320_s13] sm:$0xff]  ;;  %v478_v13 = vld [vmem:[%s1306_s17 + $0x68] sm:$0xff]  ;;  %v861_v15 = vld [vmem:[%s1306_s17 + $0xf8] sm:$0xff]  ;;  %s703_s19 = sshll.u32 %s700_s15, 4  ;;  %s1055_s22 = scalar_lea.hbm %s1426_s7, 32  ;;  %s704_s19 = int_to_ptr.hbm [resolvable:$true] %s703_s19 }
  0x5d   : > { %413 = vmatpush.msra.mxu0 %v392_v4  ;;  %482 = vmatpush.msra.mxu1 %v479_v12  ;;  %v477_v14 = vld [vmem:[%s1306_s17 + $0x60] sm:$0xff]  ;;  %v860_v16 = vld [vmem:[%s1306_s17 + $0xf0] sm:$0xff]  ;;  %v476_v18 = vld [vmem:[%s1306_s17 + $0x58] sm:$0xff]  ;;  %s1049_s30 = sshra.s32 %s704_s19, 4  ;;  %s1050_s30 = int_to_ptr.hbm [resolvable:$true] %s1049_s30 }
  0x5e   : > { %565 = vmatpush.msra.mxu2 %v842_v5  ;;  %627 = vmatpush.msra.mxu3 %v861_v15  ;;  %v859_v19 = vld [vmem:[%s1306_s17 + $0xe8] sm:$0xff]  ;;  %v475_v20 = vld [vmem:[%s1306_s17 + $0x50] sm:$0xff]  ;;  %v858_v21 = vld [vmem:[%s1306_s17 + $0xe0] sm:$0xff]  ;;  %s1051_s14 = scalar_lea.hbm %s1050_s30, 16  ;;  %p1056_p3 = scmp.lt.s32.totalorder %s1050_s30, %s1426_s7 }
  0x5f   : > { %414 = vmatpush.msra.mxu0 %v391_v6  ;;  %483 = vmatpush.msra.mxu1 %v478_v13  ;;  %v936_v17 = vpop.eup %935  ;;  %v474_v23 = vld [vmem:[%s1306_s17 + $0x48] sm:$0xff]  ;;  %v857_v24 = vld [vmem:[%s1306_s17 + $0xd8] sm:$0xff]  ;;  %v473_v25 = vld [vmem:[%s1306_s17 + $0x40] sm:$0xff]  ;;  %p1052_p6 = scmp.ne.s32.totalorder %s1050_s30, %s1051_s14  ;;  %p1057_p4 = scmp.lt.s32.totalorder %s1055_s22, %s1051_s14 }
  0x60   : > { %566 = vmatpush.msra.mxu2 %v841_v7  ;;  %839 = vmatmul.msk.f32.vlgmr.msra.gmra.mxu0 %vm395_vm0, %v390_v8  ;;  %v426_v22 = vmul.f32 8.0, %v936_v17  ;;  %v856_v26 = vld [vmem:[%s1306_s17 + $0xd0] sm:$0xff]  ;;  %v472_v28 = vld [vmem:[%s1306_s17 + $0x38] sm:$0xff]  ;;  %v855_v29 = vld [vmem:[%s1306_s17 + $0xc8] sm:$0xff]  ;;  %vm430_vm1 = vweird.f32 %v936_v17 }
  0x61   : > { %845 = vmatmul.msk.f32.vlgmr.msra.gmra.mxu2 %vm395_vm0, %v840_v9  ;;  %484 = vmatpush.msra.mxu1 %v477_v14  ;;  %v471_v33 = vld [vmem:[%s1306_s17 + $0x30] sm:$0xff]  ;;  %v854_v34 = vld [vmem:[%s1306_s17 + $0xc0] sm:$0xff]  ;;  %v470_v38 = vld [vmem:[%s1306_s17 + $0x28] sm:$0xff]  ;;  %p1053_p13 = pnand %p1052_p6, %p1198_p11  ;;  %p1058_p0 = por %p1057_p4, %p1056_p3 }
  0x62   : > { %628 = vmatpush.msra.mxu3 %v860_v16  ;;  %v427_v27 = vsub.f32 1.0, %v426_v22  ;;  %v853_v39 = vld [vmem:[%s1306_s17 + $0xb8] sm:$0xff]  ;;  %v469_v42 = vld [vmem:[%s1306_s17 + $0x20] sm:$0xff]  ;;  %v852_v43 = vld [vmem:[%s1306_s17 + $0xb0] sm:$0xff] }
  0x63   : > { %485 = vmatpush.msra.mxu1 %v476_v18  ;;  %v468_v50 = vld [vmem:[%s1306_s17 + $0x18] sm:$0xff]  ;;  %v851_v51 = vld [vmem:[%s1306_s17 + $0xa8] sm:$0xff]  ;;  %v467_v56 = vld [vmem:[%s1306_s17 + $0x10] sm:$0xff]  ;;  %p1054_p2 = pneg %p1053_p13 }
  0x64   : > { %629 = vmatpush.msra.mxu3 %v859_v19  ;;  %v428_v35 = vmul.f32 %v936_v17, %v427_v27  ;;  %v850_v57 = vld [vmem:[%s1306_s17 + $0xa0] sm:$0xff]  ;;  %v466_v63 = vld [vmem:[%s1306_s17 + $0x8] sm:$0xff]  ;;  %v849_v0 = vld [vmem:[%s1306_s17 + $0x98] sm:$0xff] }
  0x65   : > { %486 = vmatpush.msra.mxu1 %v475_v20  ;;  %v465_v4 = vld [vmem:[%s1306_s17] sm:$0xff]  ;;  %v848_v13 = vld [vmem:[%s1306_s17 + $0x90] sm:$0xff]  ;;  %v847_v14 = vld [vmem:[%s1306_s17 + $0x88] sm:$0xff]  ;;  %p1059_p5 = pnand %p1058_p0, %p1054_p2 }
  0x66   : > { %630 = vmatpush.msra.mxu3 %v858_v21  ;;  %v429_v44 = vadd.f32 %v936_v17, %v428_v35 }
  0x67   : > { %487 = vmatpush.msra.mxu1 %v474_v23 }
  0x68   : > { %631 = vmatpush.msra.mxu3 %v857_v24  ;;  %v1347_v58 = vsel %vm430_vm1, %v936_v17, %v429_v44  ;;  %v846_v17 = vld [vmem:[%s1306_s17 + $0x80] sm:$0xff] }
  0x69   : > { %488 = vmatpush.msra.mxu1 %v473_v25 }
  0x6a   : > { %632 = vmatpush.msra.mxu3 %v856_v26 }
  0x6b   : > { %489 = vmatpush.msra.mxu1 %v472_v28 }
  0x6c   : > { %633 = vmatpush.msra.mxu3 %v855_v29 }
  0x6d   : > { %490 = vmatpush.msra.mxu1 %v471_v33 }
  0x6e   : > { %634 = vmatpush.msra.mxu3 %v854_v34 }
  0x6f   : > { %491 = vmatpush.msra.mxu1 %v470_v38 }
  0x70   : > { %635 = vmatpush.msra.mxu3 %v853_v39 }
  0x71   : > { %492 = vmatpush.msra.mxu1 %v469_v42 }
  0x72   : > { %636 = vmatpush.msra.mxu3 %v852_v43 }
  0x73   : > { %493 = vmatpush.msra.mxu1 %v468_v50 }
  0x74   : > { %637 = vmatpush.msra.mxu3 %v851_v51 }
  0x75   : > { %494 = vmatpush.msra.mxu1 %v467_v56 }
  0x76   : > { %638 = vmatpush.msra.mxu3 %v850_v57 }
  0x77   : > { %495 = vmatpush.msra.mxu1 %v466_v63 }
  0x78   : > { %639 = vmatpush.msra.mxu3 %v849_v0 }
  0x79   : > { %496 = vmatpush.msra.mxu1 %v465_v4 }
  0x7a   : > { %640 = vmatpush.msra.mxu3 %v848_v13 }
  0x7c   : > { %641 = vmatpush.msra.mxu3 %v847_v14 }
  0x7e   : > { %642 = vmatpush.msra.mxu3 %v846_v17 }
  0xdd   : > { %v1324_v30 = vpop.f32.mrf.mxu0 }
  0xde   : > { %v419_v31 = vrot.slane %v1324_v30, 4  ;;  %v433_v32 = vmul.f32 %v1324_v30, %v1324_v30 }
  0xe0   : > { %v420_v36 = vadd.f32 %v419_v31, %v1324_v30  ;;  %v434_v37 = vrot.slane %v433_v32, 4  ;;  %v386_v31 = vld [vmem:[%s1422_s3] sm:$0x1] }
  0xe2   : > { %v421_v40 = vrot.slane %v420_v36, 2  ;;  %v435_v41 = vadd.f32 %v434_v37, %v433_v32  ;;  %v387_v37 = vld [vmem:[%s1423_s4] sm:$0x1] }
  0xe4   : > { %v1336_v45 = vpop.f32.mrf.mxu2  ;;  %v422_v46 = vadd.f32 %v421_v40, %v420_v36  ;;  %v436_v47 = vrot.slane %v435_v41, 2 }
  0xe5   : > { %v571_v48 = vrot.slane %v1336_v45, 4  ;;  %v578_v49 = vmul.f32 %v1336_v45, %v1336_v45 }
  0xe6   : > { %v423_v52 = vrot.slane %v422_v46, 1  ;;  %v437_v53 = vadd.f32 %v436_v47, %v435_v41 }
  0xe7   : > { %v572_v54 = vadd.f32 %v571_v48, %v1336_v45  ;;  %v579_v55 = vrot.slane %v578_v49, 4 }
  0xe8   : > { %v424_v59 = vadd.f32 %v423_v52, %v422_v46  ;;  %v438_v60 = vrot.slane %v437_v53, 1 }
  0xe9   : > { %v573_v61 = vrot.slane %v572_v54, 2  ;;  %v580_v62 = vadd.f32 %v579_v55, %v578_v49 }
  0xea   : > { %v439_v1 = vadd.f32 %v438_v60, %v437_v53  ;;  %v432_v5 = vmul.f32 %v1347_v58, %v424_v59 }
  0xeb   : > { %v574_v2 = vadd.f32 %v573_v61, %v572_v54  ;;  %v581_v3 = vrot.slane %v580_v62, 2 }
  0xec   : > { %v440_v6 = vmul.f32 %v439_v1, %v1347_v58  ;;  %v441_v9 = vmul.f32 %v432_v5, %v432_v5 }
  0xed   : > { %v575_v7 = vrot.slane %v574_v2, 1  ;;  %v582_v8 = vadd.f32 %v581_v3, %v580_v62 }
  0xee   : > { %v442_v12 = vsub.f32 %v440_v6, %v441_v9 }
  0xef   : > { %v576_v10 = vadd.f32 %v575_v7, %v574_v2  ;;  %v583_v11 = vrot.slane %v582_v8, 1 }
  0xf0   : > { %v443_v16 = vadd.f32 1e-05, %v442_v12 }
  0xf1   : > { %v584_v15 = vadd.f32 %v583_v11, %v582_v8  ;;  %v577_v18 = vmul.f32 %v576_v10, %v1347_v58 }
  0xf2   : > { %937 = vrsqrt.f32 %v443_v16  ;;  %vm450_vm2 = vweird.f32 %v443_v16 }
  0xf3   : > { %v585_v19 = vmul.f32 %v584_v15, %v1347_v58  ;;  %v586_v20 = vmul.f32 %v577_v18, %v577_v18 }
  0xf5   : > { %v587_v21 = vsub.f32 %v585_v19, %v586_v20 }
  0xf7   : > { %v588_v22 = vadd.f32 1e-05, %v587_v21 }
  0xf8   : > { %v938_v23 = vpop.eup %937 }
  0xf9   : > { %939 = vrsqrt.f32 %v588_v22  ;;  %v445_v24 = vmul.f32 %v938_v23, %v443_v16  ;;  %vm451_vm3 = vweird.f32 %v938_v23  ;;  %vm595_vm6 = vweird.f32 %v588_v22 }
  0xfa   : > { %vm452_vm4 = vmor %vm450_vm2, %vm451_vm3 }
  0xfb   : > { %v446_v25 = vmul.f32 %v938_v23, %v445_v24 }
  0xfd   : > { %v447_v26 = vmul.f32 0.5, %v446_v25 }
  0xff   : > { %v940_v27 = vpop.eup %939  ;;  %v448_v28 = vsub.f32 1.5, %v447_v26 }
 0x100   : > { %v590_v29 = vmul.f32 %v940_v27, %v588_v22  ;;  %vm596_vm5 = vweird.f32 %v940_v27 }
 0x101   : > { %v449_v32 = vmul.f32 %v938_v23, %v448_v28  ;;  %vm597_vm7 = vmor %vm595_vm6, %vm596_vm5 }
 0x102   : > { %v591_v33 = vmul.f32 %v940_v27, %v590_v29 }
 0x103   : > { %v453_v34 = vsel %vm452_vm4, %v938_v23, %v449_v32 }
 0x104   : > { %v592_v35 = vmul.f32 0.5, %v591_v33  ;;  %v454_v36 = vmul.f32 %v453_v34, %v386_v31  ;;  %v388_v34 = vld [vmem:[%s1424_s5] sm:$0x1] }
 0x106   : > { %v593_v38 = vsub.f32 1.5, %v592_v35  ;;  %v455_v39 = vmul.f32 %v454_v36, %v432_v5  ;;  %v458_v40 = vperm.slane %v454_v36, 0 }
 0x108   : > { %v594_v41 = vmul.f32 %v940_v27, %v593_v38  ;;  %v456_v42 = vsub.f32 %v387_v37, %v455_v39  ;;  %v460_v44 = vmul.f32 %v458_v40, %v1324_v30  ;;  %v389_v38 = vld [vmem:[%s1425_s6] sm:$0x1] }
 0x10a   : > { %v598_v43 = vsel %vm597_vm7, %v940_v27, %v594_v41  ;;  %v462_v46 = vperm.slane %v456_v42, 0 }
 0x10b   : > { %v599_v47 = vmul.f32 %v598_v43, %v386_v31 }
 0x10c   : > { %v464_v48 = vadd.f32 %v462_v46, %v460_v44 }
 0x10d   : > { %v600_v49 = vmul.f32 %v599_v47, %v577_v18  ;;  %v603_v50 = vperm.slane %v599_v47, 0 }
 0x10e   : > { %497 = vmatmul.f32.vlgmr.msra.gmra.mxu1 %v464_v48 }
 0x10f   : > { %v601_v51 = vsub.f32 %v387_v37, %v600_v49  ;;  %v605_v52 = vmul.f32 %v603_v50, %v1336_v45 }
 0x111   : > { %v607_v53 = vperm.slane %v601_v51, 0 }
 0x113   : > { %v609_v54 = vadd.f32 %v607_v53, %v605_v52 }
 0x115   : > { %643 = vmatmul.f32.vlgmr.msra.gmra.mxu3 %v609_v54 }
 0x18b   : > { %v498_v55 = vpop.f32.mrf.mxu1 }
 0x18c   : > { %v501_v56 = vrot.slane %v498_v55, 4  ;;  %v508_v57 = vmul.f32 %v498_v55, %v498_v55 }
 0x18e   : > { %v502_v59 = vadd.f32 %v501_v56, %v498_v55  ;;  %v509_v60 = vrot.slane %v508_v57, 4 }
 0x190   : > { %v503_v61 = vrot.slane %v502_v59, 2  ;;  %v510_v62 = vadd.f32 %v509_v60, %v508_v57 }
 0x192   : > { %v504_v30 = vadd.f32 %v503_v61, %v502_v59  ;;  %v511_v63 = vrot.slane %v510_v62, 2 }
 0x194   : > { %v505_v0 = vrot.slane %v504_v30, 1  ;;  %v512_v1 = vadd.f32 %v511_v63, %v510_v62 }
 0x196   : > { %v506_v2 = vadd.f32 %v505_v0, %v504_v30  ;;  %v513_v3 = vrot.slane %v512_v1, 1 }
 0x198   : > { %v1367_v4 = vpop.f32.mrf.mxu3  ;;  %v507_v45 = vmul.f32 %v506_v2, %v1347_v58  ;;  %v514_v5 = vadd.f32 %v513_v3, %v512_v1 }
 0x199   : > { %v647_v6 = vrot.slane %v1367_v4, 4  ;;  %v654_v7 = vmul.f32 %v1367_v4, %v1367_v4 }
 0x19a   : > { %v515_v8 = vmul.f32 %v514_v5, %v1347_v58  ;;  %v516_v9 = vmul.f32 %v507_v45, %v507_v45 }
 0x19b   : > { %v648_v10 = vadd.f32 %v647_v6, %v1367_v4  ;;  %v655_v11 = vrot.slane %v654_v7, 4 }
 0x19c   : > { %v517_v12 = vsub.f32 %v515_v8, %v516_v9 }
 0x19d   : > { %v649_v13 = vrot.slane %v648_v10, 2  ;;  %v656_v14 = vadd.f32 %v655_v11, %v654_v7 }
 0x19e   : > { %v518_v15 = vadd.f32 1e-05, %v517_v12 }
 0x19f   : > { %v650_v16 = vadd.f32 %v649_v13, %v648_v10  ;;  %v657_v17 = vrot.slane %v656_v14, 2 }
 0x1a0   : > { %941 = vrsqrt.f32 %v518_v15  ;;  %vm525_vm9 = vweird.f32 %v518_v15 }
 0x1a1   : > { %v651_v18 = vrot.slane %v650_v16, 1  ;;  %v658_v19 = vadd.f32 %v657_v17, %v656_v14 }
 0x1a3   : > { %v652_v20 = vadd.f32 %v651_v18, %v650_v16  ;;  %v659_v21 = vrot.slane %v658_v19, 1 }
 0x1a5   : > { %v653_v22 = vmul.f32 %v652_v20, %v1347_v58  ;;  %v660_v23 = vadd.f32 %v659_v21, %v658_v19 }
 0x1a6   : > { %v942_v24 = vpop.eup %941 }
 0x1a7   : > { %v661_v25 = vmul.f32 %v660_v23, %v1347_v58  ;;  %v662_v26 = vmul.f32 %v653_v22, %v653_v22  ;;  %v520_v27 = vmul.f32 %v942_v24, %v518_v15  ;;  %vm526_vm8 = vweird.f32 %v942_v24 }
 0x1a8   : > { %vm527_vm10 = vmor %vm525_vm9, %vm526_vm8 }
 0x1a9   : > { %v663_v28 = vsub.f32 %v661_v25, %v662_v26  ;;  %v521_v29 = vmul.f32 %v942_v24, %v520_v27 }
 0x1ab   : > { %v664_v31 = vadd.f32 1e-05, %v663_v28  ;;  %v522_v32 = vmul.f32 0.5, %v521_v29 }
 0x1ad   : > { %943 = vrsqrt.f32 %v664_v31  ;;  %v523_v33 = vsub.f32 1.5, %v522_v32  ;;  %vm671_vm12 = vweird.f32 %v664_v31 }
 0x1af   : > { %v524_v35 = vmul.f32 %v942_v24, %v523_v33 }
 0x1b1   : > { %v528_v36 = vsel %vm527_vm10, %v942_v24, %v524_v35 }
 0x1b2   : > { %v529_v58 = vmul.f32 %v528_v36, %v388_v34 }
 0x1b3   : > { %v944_v37 = vpop.eup %943 }
 0x1b4   : > { %v666_v39 = vmul.f32 %v944_v37, %v664_v31  ;;  %v530_v40 = vmul.f32 %v529_v58, %v507_v45  ;;  %v533_v41 = vperm.slane %v529_v58, 0  ;;  %vm672_vm11 = vweird.f32 %v944_v37 }
 0x1b5   : > { %vm673_vm13 = vmor %vm671_vm12, %vm672_vm11 }
 0x1b6   : > { %v667_v42 = vmul.f32 %v944_v37, %v666_v39  ;;  %v531_v43 = vsub.f32 %v389_v38, %v530_v40  ;;  %v535_v46 = vmul.f32 %v533_v41, %v498_v55 }
 0x1b8   : > { %v668_v44 = vmul.f32 0.5, %v667_v42  ;;  %v537_v47 = vperm.slane %v531_v43, 0 }
 0x1ba   : > { %v669_v48 = vsub.f32 1.5, %v668_v44  ;;  %v539_v49 = vadd.f32 %v537_v47, %v535_v46 }
 0x1bc   : > { %v670_v50 = vmul.f32 %v944_v37, %v669_v48  ;;  %540 = vst [vmem:[%s381_s23] sm:$0xff] %v539_v49 }
 0x1be   : > { %v674_v51 = vsel %vm673_vm13, %v944_v37, %v670_v50 }
 0x1bf   : > { %v675_v52 = vmul.f32 %v674_v51, %v388_v34 }
 0x1c1   : > { %v676_v53 = vmul.f32 %v675_v52, %v653_v22  ;;  %v679_v54 = vperm.slane %v675_v52, 0 }
 0x1c3   : > { %v677_v55 = vsub.f32 %v389_v38, %v676_v53  ;;  %v681_v56 = vmul.f32 %v679_v54, %v1367_v4 }
 0x1c5   : > { %v683_v57 = vperm.slane %v677_v55, 0 }
 0x1c7   : > { %v685_v59 = vadd.f32 %v683_v57, %v681_v56 }
 0x1c9   : > { %862 = vst [vmem:[%s381_s23 + $0x8] sm:$0xff] %v685_v59 }
 0x1ca   : > { %1062 = shalt.err (!%p1059_p5)
}
 0x1cb   : > { %s1110_s24 = smov 128   ;;  %s1111_s16 = smov 8  }
 0x1cc   : > { %880 = dma.vmem_to_hbm [thread:$0]  (%p1198_p11), %s702_s8, 256, %s704_s19, %s689_s28, %s1110_s24, %s1110_s24, %s1111_s16  }
 0x1cd PF: > { %s1450_s18 = sld [smem:[#allocation12_spill]]  ;;  %p893_p7 = pnand %p822_p9, %p1202_p12 }
 0x1cf   : > { %p894_p8 = pneg %p893_p7 }
 0x1d3   : > { %s718_s1 = sand.u32 1, %s1450_s18  }
 0x1d4   : > { %s719_s26 = scalar_lea.sflag [#allocation4], %s718_s1 }
 0x1d5   : > { %1088 = dma.done.wait (%p894_p8), %s719_s26, 256  }
 0x1d6   : > { %1090 = vsyncadd (%p894_p8), %s719_s26, 4294967040  ;;  %s1452_s27 = sld [smem:[#allocation14_spill]]  ;;  %s1455_s24 = smov %s1097_s25 }
 0x1d7   : > { %s1453_s23 = sld [smem:[#allocation13_spill]] }
 0x1d8   : > { %s1454_s26 = sld [smem:[#allocation15_spill]] }
 0x1dc   : > { %p23_p10 = scmp.ge.s32.totalorder %s1452_s27, 4  }
 0x1dd   : > { %s1456_s25 = smov %s1453_s23 }
 0x1de   :  { %25 = sbr.rel (!%p23_p10) target bundleno = 9 (0x9), region = 121 }
 0x1e3   :  { %725 = vsyncpa [#allocation3], 1 }
 0x1e4   :  { %727 = vsyncpa [#allocation3 + $0x1], 1 }
 0x1e5   :  { %728 = vsyncpa [#allocation6], 1 }
 0x1e6   :  { %730 = vsyncpa [#allocation6 + $0x1], 1 }
 0x1e7   :  { %731 = vsyncpa [#allocation4], 1 }
 0x1e8   :  { %733 = vsyncpa [#allocation4 + $0x1], 1 }

</bundles_post_ra>
